<compile_context>
chip_gen: v7x
topology: tpu7x:2x2x1
jax: 0.10.0
libtpu: 0.0.40
codegen_flags: <defaults>
</compile_context>

<pallas_src>
import jax
import jax.numpy as jnp
from jax.experimental import pallas as pl
from jax.experimental.pallas import tpu as pltpu


def cbam_kernel(x_ref, w1_ref, w2_ref, o_ref):
    """One grid step == Bb batch elements.

    x_ref : (Bb, C, HW)  input tile (HW may be ragged; Mosaic masks the tail)
    w1_ref: (C, Cr)      first Linear weight, pre-transposed (y = v @ W1^T)
    w2_ref: (Cr, C)      second Linear weight, pre-transposed
    o_ref : (Bb, C, HW)  output tile
    """
    x = x_ref[...]                                    # (Bb, C, HW)
    bb = x.shape[0]
    xf = x.astype(jnp.float32)

    # ---- spatial pooling over the (possibly ragged) lane axis ----------
    avg = jnp.mean(xf, axis=2)                        # (Bb, C)
    mx = jnp.max(xf, axis=2)                          # (Bb, C)

    # ---- shared MLP, run ONCE on the stacked [avg; max] matrix ---------
    pooled = jnp.concatenate([avg, mx], axis=0)       # (2*Bb, C)
    h = jnp.dot(pooled, w1_ref[...],
                preferred_element_type=jnp.float32)   # (2*Bb, Cr)
    h = jnp.maximum(h, 0.0)                           # ReLU
    y = jnp.dot(h, w2_ref[...],
                preferred_element_type=jnp.float32)   # (2*Bb, C)

    attn = jax.nn.sigmoid(y[:bb] + y[bb:])            # (Bb, C) f32

    # ---- broadcast per-channel attention over the spatial axis ---------
    o_ref[...] = x * attn.astype(x.dtype)[:, :, None]


def _target_block_bytes():
    """~8 MiB blocks on 128 MiB-VMEM parts (v5e/v6e), ~4 MiB elsewhere (v7x)."""
    try:
        kind = jax.devices()[0].device_kind.lower()
    except Exception:
        return 4 << 20
    if "v5" in kind or "v6" in kind:
        return 8 << 20
    return 4 << 20


def _choose_bb(B, C, HW, dtype_bytes, target_block_bytes):
    """Largest divisor of B whose block fits the VMEM target, keeping
    >= min(B, 4) grid steps (>= 2 per v7x TensorCore when B allows); even step
    counts are preferred so the two cores stay balanced.  Never pads B."""
    per_img = max(1, C * HW * dtype_bytes)
    min_steps = min(B, 4)
    eligible = [d for d in range(1, B + 1)
                if B % d == 0
                and d * per_img <= target_block_bytes
                and B // d >= min_steps]
    if not eligible:
        return 1
    even = [d for d in eligible if (B // d) % 2 == 0]
    return max(even) if even else max(eligible)


@jax.jit
def cbam_forward(x, w1, w2):
    """x: (B, C, H, W).  w1: (Cr, C), w2: (C, Cr) — PyTorch Linear layout."""
    B, C, H, W = x.shape
    Cr = w1.shape[0]
    HW = H * W
    dtype_bytes = jnp.dtype(x.dtype).itemsize

    # Unpadded (B, C, HW) view — a contiguous reshape, no extra HBM copy.
    x3 = x.reshape(B, C, HW)

    Bb = _choose_bb(B, C, HW, dtype_bytes, _target_block_bytes())
    nsteps = B // Bb

    # Right-size the scoped-VMEM request: double-buffered in + out blocks plus
    # the (small) weights and compiler headroom.  Never request a whole v7x
    # core's 64 MiB.
    block_bytes = Bb * C * HW * dtype_bytes
    weight_bytes = (w1.size + w2.size) * jnp.dtype(w1.dtype).itemsize
    need = 4 * block_bytes + 2 * weight_bytes + (4 << 20)
    vmem_limit = int(min(max(need, 16 << 20), 48 << 20))

    w1t = w1.T                                        # (C, Cr)  tiny
    w2t = w2.T                                        # (Cr, C)  tiny

    out3 = pl.pallas_call(
        cbam_kernel,
        out_shape=jax.ShapeDtypeStruct((B, C, HW), x.dtype),
        grid_spec=pltpu.PrefetchScalarGridSpec(
            num_scalar_prefetch=0,
            grid=(nsteps,),
            in_specs=[
                pl.BlockSpec((Bb, C, HW), lambda b: (b, 0, 0)),
                # Weights: constant index_map => resident across the grid.
                # (For very large C, pipeline_mode=pl.Buffered(1) would drop
                #  the second buffered copy; kept at the default here since the
                #  weights are tiny relative to the activation blocks.)
                pl.BlockSpec((C, Cr), lambda b: (0, 0)),
                pl.BlockSpec((Cr, C), lambda b: (0, 0)),
            ],
            out_specs=pl.BlockSpec((Bb, C, HW), lambda b: (b, 0, 0)),
        ),
        compiler_params=pltpu.CompilerParams(
            dimension_semantics=("parallel",),
            vmem_limit_bytes=vmem_limit),
    )(x3, w1t, w2t)

    return out3.reshape(B, C, H, W)


def cbam_reference(x, w1, w2):
    """Pure-JAX reference mirroring the PyTorch module exactly."""
    avg = jnp.mean(x, axis=(2, 3))                    # (B, C)
    mx = jnp.max(x, axis=(2, 3))                      # (B, C)

    def mlp(v):
        h = jnp.maximum(v @ w1.T, 0.0)
        return h @ w2.T

    attn = jax.nn.sigmoid(mlp(avg) + mlp(mx))         # (B, C)
    return x * attn[:, :, None, None]


def _run_case(key, B, C, H, W, ratio):
    Cr = max(1, C // ratio)
    kx, k1, k2 = jax.random.split(key, 3)
    x = jax.random.normal(kx, (B, C, H, W), dtype=jnp.float32)
    w1 = jax.random.normal(k1, (Cr, C), dtype=jnp.float32) * (1.0 / jnp.sqrt(C))
    w2 = jax.random.normal(k2, (C, Cr), dtype=jnp.float32) * (1.0 / jnp.sqrt(Cr))

    out = jax.block_until_ready(cbam_forward(x, w1, w2))
    ref = cbam_reference(x, w1, w2)
    assert out.shape == (B, C, H, W)
    assert jnp.allclose(out, ref, atol=1e-5, rtol=1e-5), \
        f"mismatch vs reference for shape {(B, C, H, W)}"


if __name__ == "__main__":
    key = jax.random.PRNGKey(0)
    k_a, k_b, k_c = jax.random.split(key, 3)

    # Case 1: lane-dense spatial extent (16*16 = 256), Bb = 1, 2 grid steps.
    _run_case(k_a, B=2, C=16, H=16, W=16, ratio=8)

    # Case 2: ragged spatial extent (7*7 = 49) with an odd batch — exercises
    # the masked-tail path with no wrapper padding/slicing at all.
    _run_case(k_b, B=3, C=24, H=7, W=7, ratio=8)

    # Case 3: Bb > 1 via divisor-of-B blocking (4 grid steps) + ragged 14x14.
    _run_case(k_c, B=8, C=32, H=14, W=14, ratio=8)

    print("KERNEL_OK")
</pallas_src>

<mosaic_0001>
module attributes {stable_mosaic.version = 11 : i64} {
  func.func @cbam_kernel(%arg0: i32, %arg1: memref<1x16x256xf32, #tpu.memory_space<vmem>>, %arg2: memref<16x2xf32, #tpu.memory_space<vmem>>, %arg3: memref<2x16xf32, #tpu.memory_space<vmem>>, %arg4: memref<1x16x256xf32, #tpu.memory_space<vmem>>) attributes {dimension_semantics = [#tpu.dimension_semantics<parallel>], iteration_bounds = array<i64: 2>, scalar_prefetch = 0 : i64, scratch_operands = 0 : i64, tpu.core_type = #tpu.core_type<tc>, window_params = [{transform_indices = @transform_0, window_bounds = array<i64: 1, 16, 256>}, {pipeline_mode = #tpu.pipeline_mode<synchronous>, transform_indices = @transform_1, window_bounds = array<i64: 16, 2>}, {pipeline_mode = #tpu.pipeline_mode<synchronous>, transform_indices = @transform_2, window_bounds = array<i64: 2, 16>}, {transform_indices = @transform_3, window_bounds = array<i64: 1, 16, 256>}]} {
    %c0 = arith.constant 0 : index
    %c0_0 = arith.constant 0 : index
    %c0_1 = arith.constant 0 : index
    %0 = vector.load %arg1[%c0, %c0_0, %c0_1] : memref<1x16x256xf32, #tpu.memory_space<vmem>>, vector<1x16x256xf32>
    %cst = arith.constant dense<0.000000e+00> : vector<1x16xf32>
    %1 = vector.multi_reduction <add>, %0, %cst [2] : vector<1x16x256xf32> to vector<1x16xf32>
    %cst_2 = arith.constant 2.560000e+02 : f32
    %2 = vector.broadcast %cst_2 : f32 to vector<1x16xf32>
    %3 = arith.divf %1, %2 : vector<1x16xf32>
    %cst_3 = arith.constant dense<0xFF800000> : vector<1x16xf32>
    %4 = vector.multi_reduction <maximumf>, %0, %cst_3 [2] : vector<1x16x256xf32> to vector<1x16xf32>
    %5 = tpu.concatenate %3, %4 in 0 : vector<1x16xf32>, vector<1x16xf32> -> vector<2x16xf32>
    %c0_4 = arith.constant 0 : index
    %c0_5 = arith.constant 0 : index
    %6 = vector.load %arg2[%c0_4, %c0_5] : memref<16x2xf32, #tpu.memory_space<vmem>>, vector<16x2xf32>
    %cst_6 = arith.constant dense<0.000000e+00> : vector<2x2xf32>
    %7 = tpu.matmul %5, %6, %cst_6 {dimension_numbers = #tpu.dot_dimension_numbers<[1], [0], [0], [1], [0, 0, 1, 1], [], []>} : vector<2x16xf32>, vector<16x2xf32>, vector<2x2xf32> -> vector<2x2xf32>
    %cst_7 = arith.constant 0.000000e+00 : f32
    %8 = vector.broadcast %cst_7 : f32 to vector<2x2xf32>
    %9 = arith.maximumf %7, %8 : vector<2x2xf32>
    %c0_8 = arith.constant 0 : index
    %c0_9 = arith.constant 0 : index
    %10 = vector.load %arg3[%c0_8, %c0_9] : memref<2x16xf32, #tpu.memory_space<vmem>>, vector<2x16xf32>
    %cst_10 = arith.constant dense<0.000000e+00> : vector<2x16xf32>
    %11 = tpu.matmul %9, %10, %cst_10 {dimension_numbers = #tpu.dot_dimension_numbers<[1], [0], [0], [1], [0, 0, 1, 1], [], []>} : vector<2x2xf32>, vector<2x16xf32>, vector<2x16xf32> -> vector<2x16xf32>
    %12 = vector.extract_strided_slice %11 {offsets = [0, 0], sizes = [1, 16], strides = [1, 1]} : vector<2x16xf32> to vector<1x16xf32>
    %13 = vector.extract_strided_slice %11 {offsets = [1, 0], sizes = [1, 16], strides = [1, 1]} : vector<2x16xf32> to vector<1x16xf32>
    %14 = arith.addf %12, %13 : vector<1x16xf32>
    %15 = arith.negf %14 : vector<1x16xf32>
    %16 = math.exp %15 : vector<1x16xf32>
    %cst_11 = arith.constant 1.000000e+00 : f32
    %17 = vector.broadcast %cst_11 : f32 to vector<1x16xf32>
    %18 = arith.addf %17, %16 : vector<1x16xf32>
    %19 = arith.divf %17, %18 : vector<1x16xf32>
    %20 = vector.shape_cast %19 : vector<1x16xf32> to vector<1x16x1xf32>
    %21 = vector.broadcast %20 : vector<1x16x1xf32> to vector<1x16x256xf32>
    %22 = arith.mulf %0, %21 : vector<1x16x256xf32>
    %c0_12 = arith.constant 0 : index
    %c0_13 = arith.constant 0 : index
    %c0_14 = arith.constant 0 : index
    %23 = vector.load %arg4[%c0_12, %c0_13, %c0_14] : memref<1x16x256xf32, #tpu.memory_space<vmem>>, vector<1x16x256xf32>
    tpu.vector_store %arg4[%c0_12, %c0_13, %c0_14], %22 {strides = array<i32>} : memref<1x16x256xf32, #tpu.memory_space<vmem>>, vector<1x16x256xf32>,
    return
  }
  func.func @transform_0(%arg0: i32) -> (i32, i32, i32) {
    %c0_i32 = arith.constant 0 : i32
    %c0_i32_0 = arith.constant 0 : i32
    %c0_i32_1 = arith.constant 0 : i32
    return %arg0, %c0_i32, %c0_i32_0 : i32, i32, i32
  }
  func.func @transform_1(%arg0: i32) -> (i32, i32) {
    %c0_i32 = arith.constant 0 : i32
    %c0_i32_0 = arith.constant 0 : i32
    %c0_i32_1 = arith.constant 0 : i32
    return %c0_i32, %c0_i32_0 : i32, i32
  }
  func.func @transform_2(%arg0: i32) -> (i32, i32) {
    %c0_i32 = arith.constant 0 : i32
    %c0_i32_0 = arith.constant 0 : i32
    %c0_i32_1 = arith.constant 0 : i32
    return %c0_i32, %c0_i32_0 : i32, i32
  }
  func.func @transform_3(%arg0: i32) -> (i32, i32, i32) {
    %c0_i32 = arith.constant 0 : i32
    %c0_i32_0 = arith.constant 0 : i32
    %c0_i32_1 = arith.constant 0 : i32
    return %arg0, %c0_i32, %c0_i32_0 : i32, i32, i32
  }
}

</mosaic_0001>

<bundles_post_ra>
// kernel: cbam_forward.1
= control target key start
LH: loop header
LB: loop body
LE: loop exit
PB: predicated region body
PF: predicated region fallthrough
CT: control target
= control target key end

     0   :  { %s543_s12 = smov 0   ;;  %s596_s0 = inlined_call_operand.vmem [shape: f32[2,16,256], index: 0, kind: input, shape index: {}]   ;;  %s597_s1 = inlined_call_operand.vmem [shape: f32[16,2], index: 1, kind: input, shape index: {}]   ;;  %s598_s2 = inlined_call_operand.vmem [shape: f32[2,16], index: 2, kind: input, shape index: {}]   ;;  %s599_s3 = inlined_call_operand.vmem [shape: f32[2,16,256], index: 3, kind: output, shape index: {}]  }
   0x1 LB: > { %s460_s13 = sadd.s32 4294967295, %s518_s12   ;;  %p464_p0 = scmp.ge.s32.totalorder %s518_s12, 1  ;;  %s518_s12 = sphi %s543_s12, %s13_s12  }
   0x2   : > { %p137_p1 = scmp.lt.s32.totalorder %s518_s12, 3 }
   0x4   : > { %p138_p2 = pnand %p464_p0, %p137_p1 }
   0x5   : > { %p161_p3 = scmp.lt.s32.totalorder (!%p138_p2), %s460_s13, 1  ;;  %v220_v8 = vld [vmem:[%s597_s1] sm:$0xff] (!%p138_p2)  ;;  %v221_v9 = vld [vmem:[%s597_s1 + $0x8] sm:$0xff] (!%p138_p2)  ;;  %v520_v11 = vmov (!%p138_p2), 0.0|0.0   ;;  %vm521_vm0 = vmmov (!%p138_p2), 0   ;;  %v522_v12 = vmov (!%p138_p2), 0.0   ;;  %v192_v13 = vlaneseq (!%p138_p2) }
   0x6   : > { %141 = sbr.rel (%p138_p2) target bundleno = 748 (0x2ec), region = 32  ;;  %v495_v10 = vpack.c.bf16 (!%p138_p2), %v221_v9, %v220_v8  ;;  %494 = vmatprep.subr.bf16.mxu0 (!%p138_p2), %v520_v11  ;;  %486 = vmatprep.mubr.msk.f32.mxu0 (!%p138_p2), %vm521_vm0, %v522_v12  ;;  %vm203_vm1 = vcmask (!%p138_p2), 130112   ;;  %vm218_vm2 = vcmask (!%p138_p2), 1040384   ;;  %vm222_vm3 = vcmask (!%p138_p2), 130048   ;;  %v297_v32 = vld [vmem:[%s598_s2] sm:$0x3] (!%p138_p2) }
   0x7   : > { %489 = vmatprep.subr.mxu1 (!%p138_p2), %v522_v12  ;;  %491 = vmatprep.mubr.msk.f32.mxu1 (!%p138_p2), %vm521_vm0, %v522_v12  ;;  %v193_v14 = vand.u32 (!%p138_p2), 127, %v192_v13  ;;  %v195_v16 = vshrl.u32 (!%p138_p2), %v192_v13, 7  ;;  %vm302_vm4 = vcmask (!%p138_p2), 1041408   ;;  %vm298_vm5 = vcmask (!%p138_p2), 15360  }
   0x8   : > { %496 = vmatpush3.bf16.msra.mxu0 (!%p138_p2), %v495_v10  ;;  %490 = vmatpush3.msk.msra.mxu1 (!%p138_p2), %vm302_vm4, %v297_v32 }
   0x9   : > { %v198_v15 = vadd.s32 (!%p138_p2), 4294967288, %v193_v14  ;;  %v196_v20 = vsub.s32 (!%p138_p2), %v193_v14, %v195_v16  ;;  %v388_v43 = vsub.s32 (!%p138_p2), 0, %v195_v16 }
   0xb   : > { %v201_v19 = vsub.s32 (!%p138_p2), %v198_v15, %v195_v16 }
   0xd   : > { %s601_s13 = smov (!%p161_p3, %s460_s13), 1 }
   0xe   : > { %s475_s14 = sshll.u32 %s601_s13, 5 }
   0xf   : > { %s165_s17 = scalar_lea.vmem %s596_s0, %s475_s14  ;;  %s170_s26 = scalar_lea.vmem %s599_s3, %s475_s14 }
  0x10   : > { %v559_v0 = vld [vmem:[%s165_s17] sm:$0xff]  ;;  %v561_v1 = vld [vmem:[%s165_s17 + $0x8] sm:$0xff]  ;;  %v563_v2 = vld [vmem:[%s165_s17 + $0x10] sm:$0xff] }
  0x11   : > { %v184_v3 = vmax.f32 %v559_v0, %v561_v1  ;;  %v175_v4 = vadd.f32 %v561_v1, %v559_v0  ;;  %v569_v5 = vld [vmem:[%s165_s17 + $0x18] sm:$0xff] }
  0x12   : > { %v187_v6 = vmax.f32 %v563_v2, %v569_v5  ;;  %v178_v7 = vadd.f32 %v569_v5, %v563_v2 }
  0x13   : > { %185 = vmax.xlane.f32.xlu1 %v184_v3  ;;  %176 = vadd.xlane.f32.xlu0 %v175_v4 }
  0x17   : > { %188 = vmax.xlane.f32.xlu1 %v187_v6  ;;  %179 = vadd.xlane.f32.xlu0 %v178_v7 }
  0xa0   : > { %v186_v17 = vpop.xlane.xlu1 %185  ;;  %v177_v18 = vpop.xlane.xlu0 %176 }
  0xa1   : > { %v182_v21 = vmul.f32 0.00390625, %v177_v18  ;;  %v211_v26 = vrot.slane %v186_v17, %v196_v20 }
  0xa3   : > { %v197_v27 = vrot.slane %v182_v21, %v196_v20 }
  0xa4   : > { %v189_v22 = vpop.xlane.xlu1 %188  ;;  %v180_v23 = vpop.xlane.xlu0 %179 }
  0xa5   : > { %v215_v24 = vrot.slane %v189_v22, %v201_v19  ;;  %v183_v25 = vmul.f32 0.00390625, %v180_v23 }
  0xa7   : > { %v202_v28 = vrot.slane %v183_v25, %v201_v19  ;;  %v216_v29 = vsel %vm203_vm1, %v215_v24, %v211_v26 }
  0xa9   : > { %v204_v30 = vsel %vm203_vm1, %v202_v28, %v197_v27 }
  0xaa   : > { %v219_v31 = vsel %vm218_vm2, %v204_v30, %v216_v29 }
  0xab   : > { %487 = vmatmul.mubr.msk.f32.vlgmr.msra.gmra.mrb[0].mxu0 %vm222_vm3, %v219_v31 }
 0x17e   : > { %v292_v33 = vpop.f32.mrb[0].mxu0 }
 0x17f   : > { %v296_v34 = vmax.f32 %v292_v33, 0.0  ;;  %v488_v35 = vpop.f32.mrb[1].mxu0 }
 0x181   : > { %492 = vmatmul.mubr.msk.f32.vlgmr.msra.gmra.mrb[0].mxu1 %vm298_vm5, %v296_v34 }
 0x254   : > { %v372_v36 = vpop.f32.mrb[0].mxu1 }
 0x255   : > { %v377_v37 = vrot.slane %v372_v36, 1  ;;  %v493_v38 = vpop.f32.mrb[1].mxu1 }
 0x257   : > { %v379_v39 = vadd.f32 %v377_v37, %v372_v36 }
 0x259   : > { %v472_v40 = vmul.f32 -1.442695, %v379_v39 }
 0x25b   : > { %508 = vpow2.f32 %v472_v40 }
 0x265   : > { %v509_v41 = vpop.eup %508 }
 0x266   : > { %v383_v42 = vadd.f32 1.0, %v509_v41 }
 0x268   : > { %510 = vrcp.f32 %v383_v42 }
 0x272   : > { %v511_v44 = vpop.eup %510 }
 0x273   : > { %v389_v45 = vrot.slane %v511_v44, %v388_v43 }
 0x275   : > { %395 = vbcast.lane.b32.xlu1 %v389_v45, 264  ;;  %391 = vbcast.lane.b32.xlu0 %v389_v45, 256 }
 0x2e7   : > { %v396_v46 = vpop.permute.xlu1 %395  ;;  %v392_v47 = vpop.permute.xlu0 %391 }
 0x2e8   : > { %v399_v48 = vmul.f32 %v396_v46, %v563_v2  ;;  %v400_v49 = vmul.f32 %v396_v46, %v569_v5  ;;  %v397_v50 = vmul.f32 %v392_v47, %v559_v0  ;;  %v398_v51 = vmul.f32 %v392_v47, %v561_v1 }
 0x2ea   : > { %403 = vst [vmem:[%s170_s26 + $0x10] sm:$0xff] %v399_v48  ;;  %404 = vst [vmem:[%s170_s26 + $0x18] sm:$0xff] %v400_v49 }
 0x2eb   : > { %401 = vst [vmem:[%s170_s26] sm:$0xff] %v397_v50  ;;  %402 = vst [vmem:[%s170_s26 + $0x8] sm:$0xff] %v398_v51 }
 0x2ec PF: > { %s13_s12 = sadd.s32 1, %s518_s12  }
 0x2ed   : > { %p10_p4 = scmp.ge.s32.totalorder %s13_s12, 4  }
 0x2ef   :  { %12 = sbr.rel (!%p10_p4) target bundleno = 1 (0x1), region = 62 }

</bundles_post_ra>
